<compile_context>
chip_gen: v7x
topology: tpu7x:2x2x1
jax: 0.10.0
libtpu: 0.0.40
codegen_flags: <defaults>
</compile_context>

<pallas_src>
import functools
from typing import NamedTuple

import jax
import jax.numpy as jnp
from jax.experimental import pallas as pl
from jax.experimental.pallas import tpu as pltpu


def _round_up(x, m):
    return ((x + m - 1) // m) * m


@functools.lru_cache(maxsize=None)
def _hw_config():
    """Per-generation tile caps + scoped-VMEM limit."""
    vmem_bytes = None
    try:
        info = pltpu.get_tpu_info()
        vmem_bytes = getattr(info, "vmem_capacity_bytes", None)
    except Exception:
        vmem_bytes = None
    if not vmem_bytes:
        vmem_bytes = 64 << 20  # conservative (v7x-class) fallback

    big_vmem = vmem_bytes >= (100 << 20)  # v5e / v6e: 128 MiB physical VMEM
    return dict(
        tm_cap=512,
        tn_cap=512,
        tk_cap=2048 if big_vmem else 1024,
        tn_decode_cap=1024,
        # Explicit scoped-VMEM limit (default is only 16 MiB on v5e); keep
        # comfortable headroom below physical capacity (64 MiB on v7x).
        vmem_limit=int(min(64 << 20, (vmem_bytes * 3) // 4)),
    )


def _split_dim(dim, cap, align):
    """Split `dim` into equal tiles (multiple of `align`, <= cap).

    Minimises the tile count first (tile count is what multiplies HBM
    re-streaming of the other operand), then balances the split so padding
    overshoot is at most `align - 1` per tile instead of up to ~2x.
    Returns (tile, padded_dim) with padded_dim = num_tiles * tile >= dim.
    """
    da = _round_up(max(dim, 1), align)
    if da <= cap:
        return da, da
    n_tiles = -(-da // cap)
    tile = _round_up(-(-da // n_tiles), align)
    return tile, n_tiles * tile


class _Cfg(NamedTuple):
    use_bias: bool
    n_out: int
    tk: int
    tn: int
    tm_cap: int
    tn_decode_cap: int
    vmem_limit: int


def _linear_bias_kernel(x_ref, w_ref, b_ref, o_ref):
    k = pl.program_id(2)

    # o_ref's block index (i, j) is constant across k, so it stays resident
    # in VMEM for the whole K reduction: initialise it with the (broadcast)
    # bias and accumulate the MXU partial products directly into it.
    @pl.when(k == 0)
    def _():
        o_ref[...] = jnp.zeros_like(o_ref) + b_ref[...].astype(jnp.float32)

    o_ref[...] += jnp.dot(
        x_ref[...], w_ref[...], preferred_element_type=jnp.float32
    )


def _linear_nobias_kernel(x_ref, w_ref, o_ref):
    k = pl.program_id(2)

    @pl.when(k == 0)
    def _():
        o_ref[...] = jnp.zeros_like(o_ref)

    o_ref[...] += jnp.dot(
        x_ref[...], w_ref[...], preferred_element_type=jnp.float32
    )


@functools.partial(jax.jit, static_argnames=("cfg",))
def _linear_pallas(x2d, wp, bp, cfg):
    """x2d: (M, K) unpadded; wp: (Kp, Np) pre-padded weight; bp: (1, Np)|None."""
    M, K = x2d.shape
    Kp, Np = wp.shape
    compute_dtype = wp.dtype

    tm, Mp = _split_dim(M, cfg.tm_cap, 8)
    tk = cfg.tk
    tn = cfg.tn

    gm = Mp // tm
    gk = Kp // tk
    gn = Np // tn

    # Decode-like regime (single M tile): widen the weight tile along N so
    # the (K, N) weight DMA reads long contiguous rows, but keep gn >= 2 so
    # both TensorCores (v7x megacore) still get work on the parallel N axis.
    if gm == 1 and gn > 1:
        for f in range(gn, 0, -1):
            if gn % f == 0 and tn * f <= cfg.tn_decode_cap and (gn // f) >= 2:
                tn = tn * f
                break
        gn = Np // tn

    # Only the activation is padded per call; W / bias were padded at init.
    xp = x2d.astype(compute_dtype)
    if Mp != M or Kp != K:
        xp = jnp.pad(xp, ((0, Mp - M), (0, Kp - K)))

    # Small-M, long-K (weight-stream-bound) shapes: deepen the RHS pipeline.
    w_kwargs = {}
    if gk >= 4 and gm == 1:
        w_kwargs["pipeline_mode"] = pl.Buffered(3)

    x_spec = pl.BlockSpec((tm, tk), lambda i, j, k: (i, k))
    w_spec = pl.BlockSpec((tk, tn), lambda i, j, k: (k, j), **w_kwargs)
    o_spec = pl.BlockSpec((tm, tn), lambda i, j, k: (i, j))

    if cfg.use_bias:
        kernel = _linear_bias_kernel
        in_specs = [x_spec, w_spec, pl.BlockSpec((1, tn), lambda i, j, k: (0, j))]
        args = (xp, wp, bp)
    else:
        kernel = _linear_nobias_kernel
        in_specs = [x_spec, w_spec]
        args = (xp, wp)

    in_item = jnp.dtype(compute_dtype).itemsize
    cost = pl.CostEstimate(
        flops=2 * Mp * Np * Kp,
        transcendentals=0,
        bytes_accessed=(
            in_item * Mp * Kp * gn      # x re-streamed once per N tile
            + in_item * Kp * Np * gm    # W re-streamed once per M tile
            + 4 * Mp * Np               # f32 output written once
        ),
    )

    out_p = pl.pallas_call(
        kernel,
        out_shape=jax.ShapeDtypeStruct((Mp, Np), jnp.float32),
        grid=(gm, gn, gk),
        in_specs=in_specs,
        out_specs=o_spec,
        compiler_params=pltpu.CompilerParams(
            dimension_semantics=("parallel", "parallel", "arbitrary"),
            vmem_limit_bytes=cfg.vmem_limit,
        ),
        cost_estimate=cost,
    )(*args)

    if Mp == M and Np == cfg.n_out:
        return out_p
    return out_p[:M, :cfg.n_out]


class PallasLinear:
    """JAX/Pallas equivalent of the PyTorch `Linear` wrapper module."""

    def __init__(self, in_features, out_features, bias=True, seed=0,
                 compute_dtype=jnp.float32):
        # compute_dtype=jnp.bfloat16 is an opt-in fast path (bf16 MXU inputs,
        # f32 accumulation); default float32 matches nn.Linear numerics.
        self.in_features = in_features
        self.out_features = out_features
        self.use_bias = bias

        hw = _hw_config()
        tk, Kp = _split_dim(in_features, hw["tk_cap"], 128)
        tn, Np = _split_dim(out_features, hw["tn_cap"], 128)
        self._cfg = _Cfg(
            use_bias=bias, n_out=out_features, tk=tk, tn=tn,
            tm_cap=hw["tm_cap"], tn_decode_cap=hw["tn_decode_cap"],
            vmem_limit=hw["vmem_limit"],
        )

        # Deterministic init mimicking nn.Linear: U(-1/sqrt(in), 1/sqrt(in)).
        # TODO(synk): does not reproduce torch.manual_seed's exact RNG stream.
        key = jax.random.PRNGKey(seed)
        k_w, k_b = jax.random.split(key)
        bound = 1.0 / (in_features ** 0.5)
        # Stored pre-transposed: (in_features, out_features).
        w = jax.random.uniform(
            k_w, (in_features, out_features), jnp.float32,
            minval=-bound, maxval=bound)
        self.weight = w  # unpadded f32 copy (for reference / checks)
        # Padded once here so the forward path never re-pads the weight.
        self.weight_padded = jnp.pad(
            w, ((0, Kp - in_features), (0, Np - out_features))
        ).astype(compute_dtype)

        if bias:
            b = jax.random.uniform(
                k_b, (out_features,), jnp.float32, minval=-bound, maxval=bound)
            self.bias = b
            self.bias_padded = jnp.pad(b, (0, Np - out_features)).reshape(1, Np)
        else:
            self.bias = None
            self.bias_padded = None

    def __call__(self, x):
        if x.shape[-1] != self.in_features:
            raise ValueError(
                '[error] putils.Linear(%s, %s): last dimension of input(%s) '
                'should equal to in_features(%s)'
                % (self.in_features, self.out_features, x.shape[-1],
                   self.in_features))
        lead = x.shape[:-1]
        x2d = x.reshape(-1, self.in_features)
        out2d = _linear_pallas(
            x2d, self.weight_padded, self.bias_padded, self._cfg)
        return out2d.reshape(*lead, self.out_features)


if __name__ == "__main__":
    in_features = 32
    out_features = 16
    batch, seq = 2, 8

    key = jax.random.PRNGKey(0)
    x = jax.random.normal(key, (batch, seq, in_features), jnp.float32)

    mod = PallasLinear(in_features, out_features, bias=True, seed=0)
    y = jax.block_until_ready(mod(x))

    # Reference check in plain JAX.
    y_ref = (x.reshape(-1, in_features) @ mod.weight + mod.bias).reshape(
        batch, seq, out_features)
    assert y.shape == (batch, seq, out_features)
    assert jnp.allclose(y, y_ref, atol=1e-5, rtol=1e-5)

    # Also exercise the no-bias path once.
    mod_nb = PallasLinear(in_features, out_features, bias=False, seed=1)
    y_nb = jax.block_until_ready(mod_nb(x))
    y_nb_ref = (x.reshape(-1, in_features) @ mod_nb.weight).reshape(
        batch, seq, out_features)
    assert jnp.allclose(y_nb, y_nb_ref, atol=1e-5, rtol=1e-5)

    print("KERNEL_OK")
</pallas_src>

<mosaic_0001>
module attributes {stable_mosaic.version = 11 : i64} {
  func.func @_linear_bias_kernel(%arg0: i32, %arg1: i32, %arg2: i32, %arg3: memref<16x128xf32, #tpu.memory_space<vmem>>, %arg4: memref<128x128xf32, #tpu.memory_space<vmem>>, %arg5: memref<1x128xf32, #tpu.memory_space<vmem>>, %arg6: memref<16x128xf32, #tpu.memory_space<vmem>>) attributes {dimension_semantics = [#tpu.dimension_semantics<parallel>, #tpu.dimension_semantics<parallel>, #tpu.dimension_semantics<arbitrary>], iteration_bounds = array<i64: 1, 1, 1>, scalar_prefetch = 0 : i64, scratch_operands = 0 : i64, tpu.core_type = #tpu.core_type<tc>, window_params = [{transform_indices = @transform_0, window_bounds = array<i64: 16, 128>}, {transform_indices = @transform_1, window_bounds = array<i64: 128, 128>}, {transform_indices = @transform_2, window_bounds = array<i64: 1, 128>}, {transform_indices = @transform_3, window_bounds = array<i64: 16, 128>}]} {
    %c0_i32 = arith.constant 0 : i32
    %0 = arith.cmpi eq, %arg2, %c0_i32 : i32
    %1 = arith.extui %0 : i1 to i32
    %c0_i32_0 = arith.constant 0 : i32
    %2 = arith.cmpi ne, %1, %c0_i32_0 : i32
    scf.if %2 {
      %cst_8 = arith.constant 0.000000e+00 : f32
      %9 = vector.broadcast %cst_8 : f32 to vector<16x128xf32>
      %c0_9 = arith.constant 0 : index
      %c0_10 = arith.constant 0 : index
      %10 = vector.load %arg5[%c0_9, %c0_10] : memref<1x128xf32, #tpu.memory_space<vmem>>, vector<1x128xf32>
      %11 = vector.broadcast %10 : vector<1x128xf32> to vector<16x128xf32>
      %12 = arith.addf %9, %11 : vector<16x128xf32>
      %c0_11 = arith.constant 0 : index
      %c0_12 = arith.constant 0 : index
      %13 = vector.load %arg6[%c0_11, %c0_12] : memref<16x128xf32, #tpu.memory_space<vmem>>, vector<16x128xf32>
      tpu.vector_store %arg6[%c0_11, %c0_12], %12 {strides = array<i32>} : memref<16x128xf32, #tpu.memory_space<vmem>>, vector<16x128xf32>,
    } else {
    }
    %c0 = arith.constant 0 : index
    %c0_1 = arith.constant 0 : index
    %3 = vector.load %arg6[%c0, %c0_1] : memref<16x128xf32, #tpu.memory_space<vmem>>, vector<16x128xf32>
    %c0_2 = arith.constant 0 : index
    %c0_3 = arith.constant 0 : index
    %4 = vector.load %arg3[%c0_2, %c0_3] : memref<16x128xf32, #tpu.memory_space<vmem>>, vector<16x128xf32>
    %c0_4 = arith.constant 0 : index
    %c0_5 = arith.constant 0 : index
    %5 = vector.load %arg4[%c0_4, %c0_5] : memref<128x128xf32, #tpu.memory_space<vmem>>, vector<128x128xf32>
    %cst = arith.constant dense<0.000000e+00> : vector<16x128xf32>
    %6 = tpu.matmul %4, %5, %cst {dimension_numbers = #tpu.dot_dimension_numbers<[1], [0], [0], [1], [0, 0, 1, 1], [], []>} : vector<16x128xf32>, vector<128x128xf32>, vector<16x128xf32> -> vector<16x128xf32>
    %7 = arith.addf %3, %6 : vector<16x128xf32>
    %c0_6 = arith.constant 0 : index
    %c0_7 = arith.constant 0 : index
    %8 = vector.load %arg6[%c0_6, %c0_7] : memref<16x128xf32, #tpu.memory_space<vmem>>, vector<16x128xf32>
    tpu.vector_store %arg6[%c0_6, %c0_7], %7 {strides = array<i32>} : memref<16x128xf32, #tpu.memory_space<vmem>>, vector<16x128xf32>,
    return
  }
  func.func @transform_0(%arg0: i32, %arg1: i32, %arg2: i32) -> (i32, i32) {
    %c0_i32 = arith.constant 0 : i32
    return %arg0, %arg2 : i32, i32
  }
  func.func @transform_1(%arg0: i32, %arg1: i32, %arg2: i32) -> (i32, i32) {
    %c0_i32 = arith.constant 0 : i32
    return %arg2, %arg1 : i32, i32
  }
  func.func @transform_2(%arg0: i32, %arg1: i32, %arg2: i32) -> (i32, i32) {
    %c0_i32 = arith.constant 0 : i32
    %c0_i32_0 = arith.constant 0 : i32
    return %c0_i32, %arg1 : i32, i32
  }
  func.func @transform_3(%arg0: i32, %arg1: i32, %arg2: i32) -> (i32, i32) {
    %c0_i32 = arith.constant 0 : i32
    return %arg0, %arg1 : i32, i32
  }
}

</mosaic_0001>

<bundles_post_ra>
// kernel: _linear_pallas.1
= control target key start
LH: loop header
LB: loop body
LE: loop exit
PB: predicated region body
PF: predicated region fallthrough
CT: control target
= control target key end

     0   :  { %8 = vsyncpa [#allocation3], 0  ;;  %s360_s0 = inlined_call_operand.vmem [shape: f32[16,128], index: 0, kind: input, shape index: {}]   ;;  %s361_s1 = inlined_call_operand.hbm [shape: f32[128,128], index: 1, kind: input, shape index: {}]   ;;  %s362_s2 = inlined_call_operand.vmem [shape: f32[1,128], index: 2, kind: input, shape index: {}]   ;;  %s363_s3 = inlined_call_operand.hbm [shape: f32[16,128], index: 3, kind: output, shape index: {}]  }
   0x1   :  { %9 = vsyncpa [#allocation4], 0  ;;  %s297_s12 = smov [#allocation2]   ;;  %s249_s16 = scalar_lea.hbm %s361_s1, 2048 }
   0x2   :  { %s17_s13 = sshll.u32 %s297_s12, 4  ;;  %p250_p0 = scmp.ne.s32.totalorder %s361_s1, %s249_s16  ;;  %s18_s13 = int_to_ptr.vmem [resolvable:$true] %s17_s13 }
   0x3   :  { %p253_p1 = scmp.lt.u32.totalorder %s249_s16, %s361_s1 }
   0x5   :  { %p255_p2 = pnand %p253_p1, %p250_p0 }
   0x7   :  { %258 = shalt.err (!%p255_p2)
}
   0x8   :  { %s259_s21 = scalar_lea.vmem %s18_s13, 2048  ;;  %p264_p4 = scmp.lt.s32.totalorder %s18_s13, %s18_s13 }
   0x9   :  { %p260_p3 = scmp.ne.s32.totalorder %s18_s13, %s259_s21  ;;  %p265_p5 = scmp.lt.s32.totalorder %s259_s21, %s259_s21 }
   0xb   :  { %p266_p6 = por %p265_p5, %p264_p4 }
   0xd   :  { %p267_p7 = pnand %p266_p6, %p260_p3 }
   0xf   :  { %270 = shalt.err (!%p267_p7)
}
  0x10   :  { %s298_s22 = smov 128   ;;  %s299_s23 = smov 8  }
  0x11   :  { %23 = dma.hbm_to_vmem [thread:$0]  %s361_s1, 2048, %s18_s13, [#allocation3], %s298_s22, %s298_s22, %s299_s23  }
  0x12   :  { %293 = dma.done.wait [#allocation3], 2048  }
  0x13   :  { %294 = vsyncadd [#allocation3], 4294965248  ;;  %v47_v0 = vld [vmem:[#allocation2] sm:$0xff]  ;;  %v48_v1 = vld [vmem:[#allocation2 + $0x8] sm:$0xff]  ;;  %s300_s4 = smov [#allocation5]  }
  0x14   :  { %v49_v2 = vld [vmem:[#allocation2 + $0x10] sm:$0xff]  ;;  %v213_v3 = vpack.c.bf16 %v48_v1, %v47_v0  ;;  %v50_v4 = vld [vmem:[#allocation2 + $0x18] sm:$0xff]  ;;  %v51_v6 = vld [vmem:[#allocation2 + $0x20] sm:$0xff]  ;;  %s147_s5 = sshll.u32 %s300_s4, 4  ;;  %s148_s5 = int_to_ptr.vmem [resolvable:$true] %s147_s5 }
  0x15   :  { %v217_v5 = vpack.c.bf16 %v50_v4, %v49_v2  ;;  %v52_v7 = vld [vmem:[#allocation2 + $0x28] sm:$0xff]  ;;  %v45_v9 = vld [vmem:[%s360_s0] sm:$0xff]  ;;  %v54_v11 = vld [vmem:[#allocation2 + $0x38] sm:$0xff]  ;;  %s271_s6 = scalar_lea.vmem %s148_s5, 256  ;;  %p276_p9 = scmp.lt.s32.totalorder %s148_s5, %s148_s5 }
  0x16   :  { %214 = vmatprep.subr.bf16.mxu0 %v213_v3  ;;  %v221_v8 = vpack.c.bf16 %v52_v7, %v51_v6  ;;  %v53_v10 = vld [vmem:[#allocation2 + $0x30] sm:$0xff]  ;;  %210 = vmatprep.mubr.f32.mxu0 %v45_v9  ;;  %v55_v13 = vld [vmem:[#allocation2 + $0x40] sm:$0xff]  ;;  %v56_v14 = vld [vmem:[#allocation2 + $0x48] sm:$0xff]  ;;  %p272_p8 = scmp.ne.s32.totalorder %s148_s5, %s271_s6  ;;  %p277_p10 = scmp.lt.s32.totalorder %s271_s6, %s271_s6 }
  0x17   :  { %216 = vmatpush3.bf16.msra.mxu0 %v213_v3  ;;  %v225_v12 = vpack.c.bf16 %v54_v11, %v53_v10  ;;  %v229_v15 = vpack.c.bf16 %v56_v14, %v55_v13  ;;  %v57_v16 = vld [vmem:[#allocation2 + $0x50] sm:$0xff]  ;;  %v58_v17 = vld [vmem:[#allocation2 + $0x58] sm:$0xff]  ;;  %v59_v19 = vld [vmem:[#allocation2 + $0x60] sm:$0xff] }
  0x18   :  { %218 = vmatprep.subr.bf16.mxu0 %v217_v5  ;;  %v233_v18 = vpack.c.bf16 %v58_v17, %v57_v16  ;;  %v60_v20 = vld [vmem:[#allocation2 + $0x68] sm:$0xff]  ;;  %v61_v22 = vld [vmem:[#allocation2 + $0x70] sm:$0xff]  ;;  %v62_v23 = vld [vmem:[#allocation2 + $0x78] sm:$0xff]  ;;  %p278_p11 = por %p277_p10, %p276_p9 }
  0x19   :  { %v237_v21 = vpack.c.bf16 %v60_v20, %v59_v19  ;;  %v241_v24 = vpack.c.bf16 %v62_v23, %v61_v22  ;;  %v46_v25 = vld [vmem:[%s360_s0 + $0x8] sm:$0xff]  ;;  %v159_v26 = vld [vmem:[%s362_s2] ss:$0 sm:$0xff] }
  0x1a   :  { %p279_p12 = pnand %p278_p11, %p272_p8 }
  0x1b   :  { %220 = vmatpush3.bf16.msra.mxu0 %v217_v5 }
  0x1c   :  { %222 = vmatprep.subr.bf16.mxu0 %v221_v8 }
  0x1f   :  { %224 = vmatpush3.bf16.msra.mxu0 %v221_v8 }
  0x20   :  { %226 = vmatprep.subr.bf16.mxu0 %v225_v12 }
  0x23   :  { %228 = vmatpush3.bf16.msra.mxu0 %v225_v12 }
  0x24   :  { %230 = vmatprep.subr.bf16.mxu0 %v229_v15 }
  0x27   :  { %232 = vmatpush3.bf16.msra.mxu0 %v229_v15 }
  0x28   :  { %234 = vmatprep.subr.bf16.mxu0 %v233_v18 }
  0x2b   :  { %236 = vmatpush3.bf16.msra.mxu0 %v233_v18 }
  0x2c   :  { %238 = vmatprep.subr.bf16.mxu0 %v237_v21 }
  0x2f   :  { %240 = vmatpush3.bf16.msra.mxu0 %v237_v21 }
  0x30   :  { %242 = vmatprep.subr.bf16.mxu0 %v241_v24 }
  0x33   :  { %244 = vmatpush3.bf16.msra.mxu0 %v241_v24 }
  0x36   :  { %211 = vmatmul.mubr.f32.vlgmr.msra.gmra.mrb[0].mxu0 %v46_v25 }
 0x109   :  { %v212_v27 = vpop.f32.mrb[0].mxu0 }
 0x10a   :  { %v139_v28 = vadd.f32 %v212_v27, %v159_v26  ;;  %v129_v29 = vpop.f32.mrb[1].mxu0 }
 0x10b   :  { %v138_v30 = vadd.f32 %v159_v26, %v129_v29 }
 0x10c   :  { %141 = vst [vmem:[#allocation5 + $0x8] sm:$0xff] %v139_v28 }
 0x10d   :  { %140 = vst [vmem:[#allocation5] sm:$0xff] %v138_v30 }
 0x10e   :  { %282 = shalt.err (!%p279_p12)
}
 0x10f   :  { %s283_s2 = scalar_lea.hbm %s363_s3, 256 }
 0x110   :  { %p284_p13 = scmp.ne.s32.totalorder %s363_s3, %s283_s2  ;;  %p287_p0 = scmp.lt.u32.totalorder %s283_s2, %s363_s3 }
 0x112   :  { %p289_p1 = pnand %p287_p0, %p284_p13 }
 0x114   :  { %292 = shalt.err (!%p289_p1)
}
 0x115   :  { %153 = dma.vmem_to_hbm [thread:$0]  %s148_s5, 256, %s363_s3, [#allocation4], %s298_s22, %s298_s22, %s299_s23  }
 0x116   :  { %295 = dma.done.wait [#allocation4], 256  }
 0x117   :  { %296 = vsyncadd [#allocation4], 4294967040 }
 0x118   :  { %157 = vsyncpa [#allocation3], 1 }
 0x119   :  { %158 = vsyncpa [#allocation4], 1 }

</bundles_post_ra>
